<compile_context>
chip_gen: v7x
topology: tpu7x:2x2x1
jax: 0.10.0
libtpu: 0.0.40
codegen_flags: <defaults>
</compile_context>

<pallas_src>
import jax
import jax.numpy as jnp
from jax import lax
from jax.experimental import pallas as pl
from jax.experimental.pallas import tpu as pltpu


# --------------------------- phase 1: input GEMM ---------------------------
def _in_proj_kernel(x_ref, w_ref, b_ref, o_ref):
    """(TR, D) f32 @ (D, H) bf16 + (1, H) f32 -> (TR, H) f32."""
    xb = x_ref[...].astype(jnp.bfloat16)
    o_ref[...] = (
        jnp.dot(xb, w_ref[...], preferred_element_type=jnp.float32) + b_ref[...]
    )


# ------------------------ phase 2: serial recurrence -----------------------
def _recurrence_kernel(xw_ref, whh_ref, hid_ref, hfin_ref):
    """Serial recurrence over the N leading slabs.

    xw_ref  : (N*S, H) f32   pre-projected inputs (x @ wxh + bxh + bhh)
    whh_ref : (H, H)   bf16
    hid_ref : (N*S, H) bf16  all hidden states (consumed by the output GEMM)
    hfin_ref: (N, H)   f32   final carried hidden state
    """
    NS, H = xw_ref.shape
    N = hfin_ref.shape[0]
    S = NS // N

    # TODO(synk): stage whh once in the MXU weight registers across the loop
    # (pltpu.matmul_push_rhs / matmul_acc_lhs / matmul_pop) to remove the
    # per-step RHS reload; kept as jnp.dot for chip-portable accumulate/pop
    # semantics (MRF on v5e/v6e vs MRB on v7x).
    def body(i, h):
        start = i * S
        if S % 8 == 0:
            start = pl.multiple_of(start, 8)
        slab = xw_ref[pl.ds(start, S), :]                        # f32, read-only ref
        hidden = jnp.tanh(
            slab
            + jnp.dot(h.astype(jnp.bfloat16), whh_ref[...],
                      preferred_element_type=jnp.float32))
        hid_ref[pl.ds(start, S), :] = hidden.astype(hid_ref.dtype)  # write-only ref
        return hidden                                            # f32 carry in vregs

    h0 = jnp.zeros((S, H), jnp.float32)
    # Full unroll only for small N; bounded partial unroll otherwise to avoid
    # vreg-spill cliffs while keeping LLO scheduling visibility.
    unroll = True if N <= 16 else 8
    h_final = lax.fori_loop(0, N, body, h0, unroll=unroll)
    hfin_ref[...] = h_final


# --------------------------- phase 3: output GEMM --------------------------
def _out_proj_kernel(h_ref, w_ref, b_ref, o_ref):
    """(TR, H) bf16 @ (H, D) bf16 + (1, D) f32 -> (TR, D) f32."""
    o_ref[...] = (
        jnp.dot(h_ref[...], w_ref[...], preferred_element_type=jnp.float32)
        + b_ref[...]
    )


def _row_tile(rows):
    """Largest of {512, 256, 128} dividing `rows`, else the full extent."""
    for t in (512, 256, 128):
        if rows % t == 0 and rows >= t:
            return t
    return rows


@jax.jit
def rnn_many_to_many(x, wxh, bxh, whh, bhh, wo, bo):
    """x: (N, S, D) with S == N (module semantics).  Returns (outputs, h):
       outputs: (N, S, D)  -- stacked version of the PyTorch list of outputs
       h      : (N, H)     -- final hidden state
    """
    N, S, D = x.shape
    H = wxh.shape[1]
    assert S == N, "module semantics require seq_len == batch_size"

    NS = N * S
    x_flat = x.reshape(NS, D)

    # Pre-fold both biases (added every step anyway); bf16 weights for the MXU.
    b_comb = (bxh + bhh).reshape(1, H).astype(jnp.float32)
    bo_r = bo.reshape(1, D).astype(jnp.float32)
    wxh_bf = wxh.astype(jnp.bfloat16)
    whh_bf = whh.astype(jnp.bfloat16)
    wo_bf = wo.astype(jnp.bfloat16)

    TR = _row_tile(NS)
    n_tiles = NS // TR

    # ----- phase 1: input projection, row-tiled, parallel grid axis -----
    xw = pl.pallas_call(
        _in_proj_kernel,
        out_shape=jax.ShapeDtypeStruct((NS, H), jnp.float32),
        grid_spec=pltpu.PrefetchScalarGridSpec(
            num_scalar_prefetch=0,
            grid=(n_tiles,),
            in_specs=[
                pl.BlockSpec((TR, D), lambda i: (i, 0)),   # x rows
                pl.BlockSpec((D, H), lambda i: (0, 0)),    # wxh (bf16)
                pl.BlockSpec((1, H), lambda i: (0, 0)),    # bxh + bhh
            ],
            out_specs=pl.BlockSpec((TR, H), lambda i: (i, 0)),
        ),
        compiler_params=pltpu.CompilerParams(dimension_semantics=("parallel",)),
    )(x_flat, wxh_bf, b_comb)

    # ----- phase 2: serial recurrence, single invocation -----
    recur_bytes = 2 * (NS * H * 4 + NS * H * 2 + N * H * 4) + H * H * 2
    recur_kwargs = {}
    if recur_bytes > 12 * 1024 * 1024:   # keep headroom vs v5e's 16 MiB scoped default
        recur_kwargs["vmem_limit_bytes"] = min(2 * recur_bytes, 100 * 1024 * 1024)

    hid, h_final = pl.pallas_call(
        _recurrence_kernel,
        out_shape=(
            jax.ShapeDtypeStruct((NS, H), jnp.bfloat16),
            jax.ShapeDtypeStruct((N, H), jnp.float32),
        ),
        grid_spec=pltpu.PrefetchScalarGridSpec(
            num_scalar_prefetch=0,
            grid=(1,),
            in_specs=[
                pl.BlockSpec((NS, H), lambda i: (0, 0)),   # pre-projected inputs
                pl.BlockSpec((H, H), lambda i: (0, 0)),    # whh (bf16)
            ],
            out_specs=[
                pl.BlockSpec((NS, H), lambda i: (0, 0)),   # all hiddens (bf16)
                pl.BlockSpec((N, H), lambda i: (0, 0)),    # final hidden (f32)
            ],
        ),
        compiler_params=pltpu.CompilerParams(
            dimension_semantics=("arbitrary",), **recur_kwargs),
    )(xw, whh_bf)

    # ----- phase 3: output projection, row-tiled, parallel grid axis -----
    out_flat = pl.pallas_call(
        _out_proj_kernel,
        out_shape=jax.ShapeDtypeStruct((NS, D), jnp.float32),
        grid_spec=pltpu.PrefetchScalarGridSpec(
            num_scalar_prefetch=0,
            grid=(n_tiles,),
            in_specs=[
                pl.BlockSpec((TR, H), lambda i: (i, 0)),   # hiddens (bf16)
                pl.BlockSpec((H, D), lambda i: (0, 0)),    # wo (bf16)
                pl.BlockSpec((1, D), lambda i: (0, 0)),    # bo
            ],
            out_specs=pl.BlockSpec((TR, D), lambda i: (i, 0)),
        ),
        compiler_params=pltpu.CompilerParams(dimension_semantics=("parallel",)),
    )(hid, wo_bf, bo_r)

    return out_flat.reshape(N, S, D), h_final


def _reference(x, wxh, bxh, whh, bhh, wo, bo):
    """Pure-JAX f32 (HIGHEST precision) replica of the PyTorch forward."""
    N, S, D = x.shape
    H = wxh.shape[1]
    hp = lax.Precision.HIGHEST
    h = jnp.zeros((N, H), jnp.float32)
    outs = []
    for i in range(N):
        inp = x[i]                                          # (S, D)
        hidden = jnp.tanh(jnp.dot(inp, wxh, precision=hp) + bxh
                          + jnp.dot(h, whh, precision=hp) + bhh)
        out = jnp.dot(hidden, wo, precision=hp) + bo
        outs.append(out)
        h = hidden
    return jnp.stack(outs, axis=0), h


if __name__ == "__main__":
    # Small shapes consistent with the module; seq == batch as required.
    batch = seq = 8
    input_size = 16
    hidden_size = 32

    key = jax.random.PRNGKey(0)
    kx, k1, k2, k3, k4, k5, k6 = jax.random.split(key, 7)

    x = jax.random.normal(kx, (batch, seq, input_size), jnp.float32)

    # Deterministic parameter init (PyTorch-Linear-style uniform bounds),
    # stored transposed as (in, out) for right-multiplication in the kernel.
    def uinit(k, shape, fan_in):
        bound = 1.0 / jnp.sqrt(jnp.float32(fan_in))
        return jax.random.uniform(k, shape, jnp.float32, -bound, bound)

    wxh = uinit(k1, (input_size, hidden_size), input_size)
    bxh = uinit(k2, (1, hidden_size), input_size)
    whh = uinit(k3, (hidden_size, hidden_size), hidden_size)
    bhh = uinit(k4, (1, hidden_size), hidden_size)
    wo = uinit(k5, (hidden_size, input_size), hidden_size)
    bo = uinit(k6, (1, input_size), hidden_size)

    outputs, h = rnn_many_to_many(x, wxh, bxh, whh, bhh, wo, bo)
    outputs = jax.block_until_ready(outputs)
    h = jax.block_until_ready(h)

    ref_out, ref_h = _reference(x, wxh, bxh, whh, bhh, wo, bo)
    # Kernel uses bf16 MXU operands (f32 accumulation); compare against the
    # f32 HIGHEST-precision reference with bf16-appropriate tolerances.
    assert jnp.allclose(outputs, ref_out, atol=5e-2, rtol=5e-2), (
        float(jnp.max(jnp.abs(outputs - ref_out))))
    assert jnp.allclose(h, ref_h, atol=5e-2, rtol=5e-2), (
        float(jnp.max(jnp.abs(h - ref_h))))

    print("KERNEL_OK")
</pallas_src>

<mosaic_0001>
module attributes {stable_mosaic.version = 11 : i64} {
  func.func @_in_proj_kernel(%arg0: i32, %arg1: memref<64x16xf32, #tpu.memory_space<vmem>>, %arg2: memref<16x32xbf16, #tpu.memory_space<vmem>>, %arg3: memref<1x32xf32, #tpu.memory_space<vmem>>, %arg4: memref<64x32xf32, #tpu.memory_space<vmem>>) attributes {dimension_semantics = [#tpu.dimension_semantics<parallel>], iteration_bounds = array<i64: 1>, scalar_prefetch = 0 : i64, scratch_operands = 0 : i64, tpu.core_type = #tpu.core_type<tc>, window_params = [{transform_indices = @transform_0, window_bounds = array<i64: 64, 16>}, {pipeline_mode = #tpu.pipeline_mode<synchronous>, transform_indices = @transform_1, window_bounds = array<i64: 16, 32>}, {pipeline_mode = #tpu.pipeline_mode<synchronous>, transform_indices = @transform_2, window_bounds = array<i64: 1, 32>}, {transform_indices = @transform_3, window_bounds = array<i64: 64, 32>}]} {
    %c0 = arith.constant 0 : index
    %c0_0 = arith.constant 0 : index
    %0 = vector.load %arg1[%c0, %c0_0] : memref<64x16xf32, #tpu.memory_space<vmem>>, vector<64x16xf32>
    %1 = arith.truncf %0 : vector<64x16xf32> to vector<64x16xbf16>
    %c0_1 = arith.constant 0 : index
    %c0_2 = arith.constant 0 : index
    %2 = vector.load %arg2[%c0_1, %c0_2] : memref<16x32xbf16, #tpu.memory_space<vmem>>, vector<16x32xbf16>
    %cst = arith.constant dense<0.000000e+00> : vector<64x32xf32>
    %3 = tpu.matmul %1, %2, %cst {dimension_numbers = #tpu.dot_dimension_numbers<[1], [0], [0], [1], [0, 0, 1, 1], [], []>} : vector<64x16xbf16>, vector<16x32xbf16>, vector<64x32xf32> -> vector<64x32xf32>
    %c0_3 = arith.constant 0 : index
    %c0_4 = arith.constant 0 : index
    %4 = vector.load %arg3[%c0_3, %c0_4] : memref<1x32xf32, #tpu.memory_space<vmem>>, vector<1x32xf32>
    %5 = vector.broadcast %4 : vector<1x32xf32> to vector<64x32xf32>
    %6 = arith.addf %3, %5 : vector<64x32xf32>
    %c0_5 = arith.constant 0 : index
    %c0_6 = arith.constant 0 : index
    %7 = vector.load %arg4[%c0_5, %c0_6] : memref<64x32xf32, #tpu.memory_space<vmem>>, vector<64x32xf32>
    tpu.vector_store %arg4[%c0_5, %c0_6], %6 {strides = array<i32>} : memref<64x32xf32, #tpu.memory_space<vmem>>, vector<64x32xf32>,
    return
  }
  func.func @transform_0(%arg0: i32) -> (i32, i32) {
    %c0_i32 = arith.constant 0 : i32
    %c0_i32_0 = arith.constant 0 : i32
    return %arg0, %c0_i32 : i32, i32
  }
  func.func @transform_1(%arg0: i32) -> (i32, i32) {
    %c0_i32 = arith.constant 0 : i32
    %c0_i32_0 = arith.constant 0 : i32
    %c0_i32_1 = arith.constant 0 : i32
    return %c0_i32, %c0_i32_0 : i32, i32
  }
  func.func @transform_2(%arg0: i32) -> (i32, i32) {
    %c0_i32 = arith.constant 0 : i32
    %c0_i32_0 = arith.constant 0 : i32
    %c0_i32_1 = arith.constant 0 : i32
    return %c0_i32, %c0_i32_0 : i32, i32
  }
  func.func @transform_3(%arg0: i32) -> (i32, i32) {
    %c0_i32 = arith.constant 0 : i32
    %c0_i32_0 = arith.constant 0 : i32
    return %arg0, %c0_i32 : i32, i32
  }
}

module attributes {stable_mosaic.version = 11 : i64} {
  func.func @_recurrence_kernel(%arg0: i32, %arg1: memref<64x32xf32, #tpu.memory_space<vmem>>, %arg2: memref<32x32xbf16, #tpu.memory_space<vmem>>, %arg3: memref<64x32xbf16, #tpu.memory_space<vmem>>, %arg4: memref<8x32xf32, #tpu.memory_space<vmem>>) attributes {dimension_semantics = [#tpu.dimension_semantics<arbitrary>], iteration_bounds = array<i64: 1>, scalar_prefetch = 0 : i64, scratch_operands = 0 : i64, tpu.core_type = #tpu.core_type<tc>, window_params = [{pipeline_mode = #tpu.pipeline_mode<synchronous>, transform_indices = @transform_0, window_bounds = array<i64: 64, 32>}, {pipeline_mode = #tpu.pipeline_mode<synchronous>, transform_indices = @transform_1, window_bounds = array<i64: 32, 32>}, {pipeline_mode = #tpu.pipeline_mode<synchronous>, transform_indices = @transform_2, window_bounds = array<i64: 64, 32>}, {pipeline_mode = #tpu.pipeline_mode<synchronous>, transform_indices = @transform_3, window_bounds = array<i64: 8, 32>}]} {
    %cst = arith.constant 0.000000e+00 : f32
    %0 = vector.broadcast %cst : f32 to vector<8x32xf32>
    %c0_i32 = arith.constant 0 : i32
    %c8_i32 = arith.constant 8 : i32
    %1 = arith.muli %c0_i32, %c8_i32 : i32
    %2 = tpu.assume_multiple %1, 8 : i32
    %3 = arith.index_cast %2 : i32 to index
    %c0 = arith.constant 0 : index
    %4 = vector.load %arg1[%3, %c0] : memref<64x32xf32, #tpu.memory_space<vmem>>, vector<8x32xf32>
    %5 = arith.truncf %0 : vector<8x32xf32> to vector<8x32xbf16>
    %c0_0 = arith.constant 0 : index
    %c0_1 = arith.constant 0 : index
    %6 = vector.load %arg2[%c0_0, %c0_1] : memref<32x32xbf16, #tpu.memory_space<vmem>>, vector<32x32xbf16>
    %cst_2 = arith.constant dense<0.000000e+00> : vector<8x32xf32>
    %7 = tpu.matmul %5, %6, %cst_2 {dimension_numbers = #tpu.dot_dimension_numbers<[1], [0], [0], [1], [0, 0, 1, 1], [], []>} : vector<8x32xbf16>, vector<32x32xbf16>, vector<8x32xf32> -> vector<8x32xf32>
    %8 = arith.addf %4, %7 : vector<8x32xf32>
    %9 = math.tanh %8 : vector<8x32xf32>
    %10 = arith.truncf %9 : vector<8x32xf32> to vector<8x32xbf16>
    %11 = arith.index_cast %2 : i32 to index
    %c0_3 = arith.constant 0 : index
    %12 = vector.load %arg3[%11, %c0_3] : memref<64x32xbf16, #tpu.memory_space<vmem>>, vector<8x32xbf16>
    tpu.vector_store %arg3[%11, %c0_3], %10 {strides = array<i32>} : memref<64x32xbf16, #tpu.memory_space<vmem>>, vector<8x32xbf16>,
    %c1_i32 = arith.constant 1 : i32
    %c8_i32_4 = arith.constant 8 : i32
    %13 = arith.muli %c1_i32, %c8_i32_4 : i32
    %14 = tpu.assume_multiple %13, 8 : i32
    %15 = arith.index_cast %14 : i32 to index
    %c0_5 = arith.constant 0 : index
    %16 = vector.load %arg1[%15, %c0_5] : memref<64x32xf32, #tpu.memory_space<vmem>>, vector<8x32xf32>
    %17 = arith.truncf %9 : vector<8x32xf32> to vector<8x32xbf16>
    %c0_6 = arith.constant 0 : index
    %c0_7 = arith.constant 0 : index
    %18 = vector.load %arg2[%c0_6, %c0_7] : memref<32x32xbf16, #tpu.memory_space<vmem>>, vector<32x32xbf16>
    %cst_8 = arith.constant dense<0.000000e+00> : vector<8x32xf32>
    %19 = tpu.matmul %17, %18, %cst_8 {dimension_numbers = #tpu.dot_dimension_numbers<[1], [0], [0], [1], [0, 0, 1, 1], [], []>} : vector<8x32xbf16>, vector<32x32xbf16>, vector<8x32xf32> -> vector<8x32xf32>
    %20 = arith.addf %16, %19 : vector<8x32xf32>
    %21 = math.tanh %20 : vector<8x32xf32>
    %22 = arith.truncf %21 : vector<8x32xf32> to vector<8x32xbf16>
    %23 = arith.index_cast %14 : i32 to index
    %c0_9 = arith.constant 0 : index
    %24 = vector.load %arg3[%23, %c0_9] : memref<64x32xbf16, #tpu.memory_space<vmem>>, vector<8x32xbf16>
    tpu.vector_store %arg3[%23, %c0_9], %22 {strides = array<i32>} : memref<64x32xbf16, #tpu.memory_space<vmem>>, vector<8x32xbf16>,
    %c2_i32 = arith.constant 2 : i32
    %c8_i32_10 = arith.constant 8 : i32
    %25 = arith.muli %c2_i32, %c8_i32_10 : i32
    %26 = tpu.assume_multiple %25, 8 : i32
    %27 = arith.index_cast %26 : i32 to index
    %c0_11 = arith.constant 0 : index
    %28 = vector.load %arg1[%27, %c0_11] : memref<64x32xf32, #tpu.memory_space<vmem>>, vector<8x32xf32>
    %29 = arith.truncf %21 : vector<8x32xf32> to vector<8x32xbf16>
    %c0_12 = arith.constant 0 : index
    %c0_13 = arith.constant 0 : index
    %30 = vector.load %arg2[%c0_12, %c0_13] : memref<32x32xbf16, #tpu.memory_space<vmem>>, vector<32x32xbf16>
    %cst_14 = arith.constant dense<0.000000e+00> : vector<8x32xf32>
    %31 = tpu.matmul %29, %30, %cst_14 {dimension_numbers = #tpu.dot_dimension_numbers<[1], [0], [0], [1], [0, 0, 1, 1], [], []>} : vector<8x32xbf16>, vector<32x32xbf16>, vector<8x32xf32> -> vector<8x32xf32>
    %32 = arith.addf %28, %31 : vector<8x32xf32>
    %33 = math.tanh %32 : vector<8x32xf32>
    %34 = arith.truncf %33 : vector<8x32xf32> to vector<8x32xbf16>
    %35 = arith.index_cast %26 : i32 to index
    %c0_15 = arith.constant 0 : index
    %36 = vector.load %arg3[%35, %c0_15] : memref<64x32xbf16, #tpu.memory_space<vmem>>, vector<8x32xbf16>
    tpu.vector_store %arg3[%35, %c0_15], %34 {strides = array<i32>} : memref<64x32xbf16, #tpu.memory_space<vmem>>, vector<8x32xbf16>,
    %c3_i32 = arith.constant 3 : i32
    %c8_i32_16 = arith.constant 8 : i32
    %37 = arith.muli %c3_i32, %c8_i32_16 : i32
    %38 = tpu.assume_multiple %37, 8 : i32
    %39 = arith.index_cast %38 : i32 to index
    %c0_17 = arith.constant 0 : index
    %40 = vector.load %arg1[%39, %c0_17] : memref<64x32xf32, #tpu.memory_space<vmem>>, vector<8x32xf32>
    %41 = arith.truncf %33 : vector<8x32xf32> to vector<8x32xbf16>
    %c0_18 = arith.constant 0 : index
    %c0_19 = arith.constant 0 : index
    %42 = vector.load %arg2[%c0_18, %c0_19] : memref<32x32xbf16, #tpu.memory_space<vmem>>, vector<32x32xbf16>
    %cst_20 = arith.constant dense<0.000000e+00> : vector<8x32xf32>
    %43 = tpu.matmul %41, %42, %cst_20 {dimension_numbers = #tpu.dot_dimension_numbers<[1], [0], [0], [1], [0, 0, 1, 1], [], []>} : vector<8x32xbf16>, vector<32x32xbf16>, vector<8x32xf32> -> vector<8x32xf32>
    %44 = arith.addf %40, %43 : vector<8x32xf32>
    %45 = math.tanh %44 : vector<8x32xf32>
    %46 = arith.truncf %45 : vector<8x32xf32> to vector<8x32xbf16>
    %47 = arith.index_cast %38 : i32 to index
    %c0_21 = arith.constant 0 : index
    %48 = vector.load %arg3[%47, %c0_21] : memref<64x32xbf16, #tpu.memory_space<vmem>>, vector<8x32xbf16>
    tpu.vector_store %arg3[%47, %c0_21], %46 {strides = array<i32>} : memref<64x32xbf16, #tpu.memory_space<vmem>>, vector<8x32xbf16>,
    %c4_i32 = arith.constant 4 : i32
    %c8_i32_22 = arith.constant 8 : i32
    %49 = arith.muli %c4_i32, %c8_i32_22 : i32
    %50 = tpu.assume_multiple %49, 8 : i32
    %51 = arith.index_cast %50 : i32 to index
    %c0_23 = arith.constant 0 : index
    %52 = vector.load %arg1[%51, %c0_23] : memref<64x32xf32, #tpu.memory_space<vmem>>, vector<8x32xf32>
    %53 = arith.truncf %45 : vector<8x32xf32> to vector<8x32xbf16>
    %c0_24 = arith.constant 0 : index
    %c0_25 = arith.constant 0 : index
    %54 = vector.load %arg2[%c0_24, %c0_25] : memref<32x32xbf16, #tpu.memory_space<vmem>>, vector<32x32xbf16>
    %cst_26 = arith.constant dense<0.000000e+00> : vector<8x32xf32>
    %55 = tpu.matmul %53, %54, %cst_26 {dimension_numbers = #tpu.dot_dimension_numbers<[1], [0], [0], [1], [0, 0, 1, 1], [], []>} : vector<8x32xbf16>, vector<32x32xbf16>, vector<8x32xf32> -> vector<8x32xf32>
    %56 = arith.addf %52, %55 : vector<8x32xf32>
    %57 = math.tanh %56 : vector<8x32xf32>
    %58 = arith.truncf %57 : vector<8x32xf32> to vector<8x32xbf16>
    %59 = arith.index_cast %50 : i32 to index
    %c0_27 = arith.constant 0 : index
    %60 = vector.load %arg3[%59, %c0_27] : memref<64x32xbf16, #tpu.memory_space<vmem>>, vector<8x32xbf16>
    tpu.vector_store %arg3[%59, %c0_27], %58 {strides = array<i32>} : memref<64x32xbf16, #tpu.memory_space<vmem>>, vector<8x32xbf16>,
    %c5_i32 = arith.constant 5 : i32
    %c8_i32_28 = arith.constant 8 : i32
    %61 = arith.muli %c5_i32, %c8_i32_28 : i32
    %62 = tpu.assume_multiple %61, 8 : i32
    %63 = arith.index_cast %62 : i32 to index
    %c0_29 = arith.constant 0 : index
    %64 = vector.load %arg1[%63, %c0_29] : memref<64x32xf32, #tpu.memory_space<vmem>>, vector<8x32xf32>
    %65 = arith.truncf %57 : vector<8x32xf32> to vector<8x32xbf16>
    %c0_30 = arith.constant 0 : index
    %c0_31 = arith.constant 0 : index
    %66 = vector.load %arg2[%c0_30, %c0_31] : memref<32x32xbf16, #tpu.memory_space<vmem>>, vector<32x32xbf16>
    %cst_32 = arith.constant dense<0.000000e+00> : vector<8x32xf32>
    %67 = tpu.matmul %65, %66, %cst_32 {dimension_numbers = #tpu.dot_dimension_numbers<[1], [0], [0], [1], [0, 0, 1, 1], [], []>} : vector<8x32xbf16>, vector<32x32xbf16>, vector<8x32xf32> -> vector<8x32xf32>
    %68 = arith.addf %64, %67 : vector<8x32xf32>
    %69 = math.tanh %68 : vector<8x32xf32>
    %70 = arith.truncf %69 : vector<8x32xf32> to vector<8x32xbf16>
    %71 = arith.index_cast %62 : i32 to index
    %c0_33 = arith.constant 0 : index
    %72 = vector.load %arg3[%71, %c0_33] : memref<64x32xbf16, #tpu.memory_space<vmem>>, vector<8x32xbf16>
    tpu.vector_store %arg3[%71, %c0_33], %70 {strides = array<i32>} : memref<64x32xbf16, #tpu.memory_space<vmem>>, vector<8x32xbf16>,
    %c6_i32 = arith.constant 6 : i32
    %c8_i32_34 = arith.constant 8 : i32
    %73 = arith.muli %c6_i32, %c8_i32_34 : i32
    %74 = tpu.assume_multiple %73, 8 : i32
    %75 = arith.index_cast %74 : i32 to index
    %c0_35 = arith.constant 0 : index
    %76 = vector.load %arg1[%75, %c0_35] : memref<64x32xf32, #tpu.memory_space<vmem>>, vector<8x32xf32>
    %77 = arith.truncf %69 : vector<8x32xf32> to vector<8x32xbf16>
    %c0_36 = arith.constant 0 : index
    %c0_37 = arith.constant 0 : index
    %78 = vector.load %arg2[%c0_36, %c0_37] : memref<32x32xbf16, #tpu.memory_space<vmem>>, vector<32x32xbf16>
    %cst_38 = arith.constant dense<0.000000e+00> : vector<8x32xf32>
    %79 = tpu.matmul %77, %78, %cst_38 {dimension_numbers = #tpu.dot_dimension_numbers<[1], [0], [0], [1], [0, 0, 1, 1], [], []>} : vector<8x32xbf16>, vector<32x32xbf16>, vector<8x32xf32> -> vector<8x32xf32>
    %80 = arith.addf %76, %79 : vector<8x32xf32>
    %81 = math.tanh %80 : vector<8x32xf32>
    %82 = arith.truncf %81 : vector<8x32xf32> to vector<8x32xbf16>
    %83 = arith.index_cast %74 : i32 to index
    %c0_39 = arith.constant 0 : index
    %84 = vector.load %arg3[%83, %c0_39] : memref<64x32xbf16, #tpu.memory_space<vmem>>, vector<8x32xbf16>
    tpu.vector_store %arg3[%83, %c0_39], %82 {strides = array<i32>} : memref<64x32xbf16, #tpu.memory_space<vmem>>, vector<8x32xbf16>,
    %c7_i32 = arith.constant 7 : i32
    %c8_i32_40 = arith.constant 8 : i32
    %85 = arith.muli %c7_i32, %c8_i32_40 : i32
    %86 = tpu.assume_multiple %85, 8 : i32
    %87 = arith.index_cast %86 : i32 to index
    %c0_41 = arith.constant 0 : index
    %88 = vector.load %arg1[%87, %c0_41] : memref<64x32xf32, #tpu.memory_space<vmem>>, vector<8x32xf32>
    %89 = arith.truncf %81 : vector<8x32xf32> to vector<8x32xbf16>
    %c0_42 = arith.constant 0 : index
    %c0_43 = arith.constant 0 : index
    %90 = vector.load %arg2[%c0_42, %c0_43] : memref<32x32xbf16, #tpu.memory_space<vmem>>, vector<32x32xbf16>
    %cst_44 = arith.constant dense<0.000000e+00> : vector<8x32xf32>
    %91 = tpu.matmul %89, %90, %cst_44 {dimension_numbers = #tpu.dot_dimension_numbers<[1], [0], [0], [1], [0, 0, 1, 1], [], []>} : vector<8x32xbf16>, vector<32x32xbf16>, vector<8x32xf32> -> vector<8x32xf32>
    %92 = arith.addf %88, %91 : vector<8x32xf32>
    %93 = math.tanh %92 : vector<8x32xf32>
    %94 = arith.truncf %93 : vector<8x32xf32> to vector<8x32xbf16>
    %95 = arith.index_cast %86 : i32 to index
    %c0_45 = arith.constant 0 : index
    %96 = vector.load %arg3[%95, %c0_45] : memref<64x32xbf16, #tpu.memory_space<vmem>>, vector<8x32xbf16>
    tpu.vector_store %arg3[%95, %c0_45], %94 {strides = array<i32>} : memref<64x32xbf16, #tpu.memory_space<vmem>>, vector<8x32xbf16>,
    %c8_i32_46 = arith.constant 8 : i32
    %c0_47 = arith.constant 0 : index
    %c0_48 = arith.constant 0 : index
    %97 = vector.load %arg4[%c0_47, %c0_48] : memref<8x32xf32, #tpu.memory_space<vmem>>, vector<8x32xf32>
    tpu.vector_store %arg4[%c0_47, %c0_48], %93 {strides = array<i32>} : memref<8x32xf32, #tpu.memory_space<vmem>>, vector<8x32xf32>,
    return
  }
  func.func @transform_0(%arg0: i32) -> (i32, i32) {
    %c0_i32 = arith.constant 0 : i32
    %c0_i32_0 = arith.constant 0 : i32
    %c0_i32_1 = arith.constant 0 : i32
    return %c0_i32, %c0_i32_0 : i32, i32
  }
  func.func @transform_1(%arg0: i32) -> (i32, i32) {
    %c0_i32 = arith.constant 0 : i32
    %c0_i32_0 = arith.constant 0 : i32
    %c0_i32_1 = arith.constant 0 : i32
    return %c0_i32, %c0_i32_0 : i32, i32
  }
  func.func @transform_2(%arg0: i32) -> (i32, i32) {
    %c0_i32 = arith.constant 0 : i32
    %c0_i32_0 = arith.constant 0 : i32
    %c0_i32_1 = arith.constant 0 : i32
    return %c0_i32, %c0_i32_0 : i32, i32
  }
  func.func @transform_3(%arg0: i32) -> (i32, i32) {
    %c0_i32 = arith.constant 0 : i32
    %c0_i32_0 = arith.constant 0 : i32
    %c0_i32_1 = arith.constant 0 : i32
    return %c0_i32, %c0_i32_0 : i32, i32
  }
}

module attributes {stable_mosaic.version = 11 : i64} {
  func.func @_out_proj_kernel(%arg0: i32, %arg1: memref<64x32xbf16, #tpu.memory_space<vmem>>, %arg2: memref<32x16xbf16, #tpu.memory_space<vmem>>, %arg3: memref<1x16xf32, #tpu.memory_space<vmem>>, %arg4: memref<64x16xf32, #tpu.memory_space<vmem>>) attributes {dimension_semantics = [#tpu.dimension_semantics<parallel>], iteration_bounds = array<i64: 1>, scalar_prefetch = 0 : i64, scratch_operands = 0 : i64, tpu.core_type = #tpu.core_type<tc>, window_params = [{transform_indices = @transform_0, window_bounds = array<i64: 64, 32>}, {pipeline_mode = #tpu.pipeline_mode<synchronous>, transform_indices = @transform_1, window_bounds = array<i64: 32, 16>}, {pipeline_mode = #tpu.pipeline_mode<synchronous>, transform_indices = @transform_2, window_bounds = array<i64: 1, 16>}, {transform_indices = @transform_3, window_bounds = array<i64: 64, 16>}]} {
    %c0 = arith.constant 0 : index
    %c0_0 = arith.constant 0 : index
    %0 = vector.load %arg1[%c0, %c0_0] : memref<64x32xbf16, #tpu.memory_space<vmem>>, vector<64x32xbf16>
    %c0_1 = arith.constant 0 : index
    %c0_2 = arith.constant 0 : index
    %1 = vector.load %arg2[%c0_1, %c0_2] : memref<32x16xbf16, #tpu.memory_space<vmem>>, vector<32x16xbf16>
    %cst = arith.constant dense<0.000000e+00> : vector<64x16xf32>
    %2 = tpu.matmul %0, %1, %cst {dimension_numbers = #tpu.dot_dimension_numbers<[1], [0], [0], [1], [0, 0, 1, 1], [], []>} : vector<64x32xbf16>, vector<32x16xbf16>, vector<64x16xf32> -> vector<64x16xf32>
    %c0_3 = arith.constant 0 : index
    %c0_4 = arith.constant 0 : index
    %3 = vector.load %arg3[%c0_3, %c0_4] : memref<1x16xf32, #tpu.memory_space<vmem>>, vector<1x16xf32>
    %4 = vector.broadcast %3 : vector<1x16xf32> to vector<64x16xf32>
    %5 = arith.addf %2, %4 : vector<64x16xf32>
    %c0_5 = arith.constant 0 : index
    %c0_6 = arith.constant 0 : index
    %6 = vector.load %arg4[%c0_5, %c0_6] : memref<64x16xf32, #tpu.memory_space<vmem>>, vector<64x16xf32>
    tpu.vector_store %arg4[%c0_5, %c0_6], %5 {strides = array<i32>} : memref<64x16xf32, #tpu.memory_space<vmem>>, vector<64x16xf32>,
    return
  }
  func.func @transform_0(%arg0: i32) -> (i32, i32) {
    %c0_i32 = arith.constant 0 : i32
    %c0_i32_0 = arith.constant 0 : i32
    return %arg0, %c0_i32 : i32, i32
  }
  func.func @transform_1(%arg0: i32) -> (i32, i32) {
    %c0_i32 = arith.constant 0 : i32
    %c0_i32_0 = arith.constant 0 : i32
    %c0_i32_1 = arith.constant 0 : i32
    return %c0_i32, %c0_i32_0 : i32, i32
  }
  func.func @transform_2(%arg0: i32) -> (i32, i32) {
    %c0_i32 = arith.constant 0 : i32
    %c0_i32_0 = arith.constant 0 : i32
    %c0_i32_1 = arith.constant 0 : i32
    return %c0_i32, %c0_i32_0 : i32, i32
  }
  func.func @transform_3(%arg0: i32) -> (i32, i32) {
    %c0_i32 = arith.constant 0 : i32
    %c0_i32_0 = arith.constant 0 : i32
    return %arg0, %c0_i32 : i32, i32
  }
}

</mosaic_0001>

<bundles_post_ra>
// kernel: rnn_many_to_many.5
= control target key start
LH: loop header
LB: loop body
LE: loop exit
PB: predicated region body
PF: predicated region fallthrough
CT: control target
= control target key end

     0   :  { %vm67_vm0 = vcmask 261120   ;;  %s300_s0 = inlined_call_operand.vmem [shape: bf16[64,32], index: 0, kind: input, shape index: {}]   ;;  %s301_s1 = inlined_call_operand.vmem [shape: bf16[32,16], index: 1, kind: input, shape index: {}]   ;;  %s302_s2 = inlined_call_operand.vmem [shape: f32[1,16], index: 2, kind: input, shape index: {}]   ;;  %s303_s3 = inlined_call_operand.hbm [shape: f32[64,16], index: 3, kind: output, shape index: {}]  }
   0x1   :  { %v206_v0 = vld [vmem:[%s301_s1] sm:$0xff]   ;;  %v207_v1 = vld [vmem:[%s301_s1 + $0x8] sm:$0xff]   ;;  %v209_v3 = vld [vmem:[%s300_s0 + $0x10] sm:$0xff]  }
   0x2   :  { %187 = vmatprep.subr.bf16.mxu0 %v206_v0  ;;  %199 = vmatprep.subr.bf16.mxu1 %v206_v0  ;;  %v208_v2 = vld [vmem:[%s300_s0] sm:$0xff]   ;;  %v210_v4 = vld [vmem:[%s300_s0 + $0x8] sm:$0xff]   ;;  %v211_v5 = vld [vmem:[%s300_s0 + $0x18] sm:$0xff]  }
   0x3   :  { %188 = vmatpush3.bf16.msra.mxu0 %v206_v0  ;;  %201 = vmatpush3.bf16.msra.mxu1 %v206_v0 }
   0x4   :  { %189 = vmatprep.subr.bf16.mxu0 %v207_v1  ;;  %200 = vmatprep.subr.bf16.mxu1 %v207_v1 }
   0x5   :  { %191 = vmatprep.mubr.msk.bf16.mxu0 %vm67_vm0, %v208_v2  ;;  %195 = vmatprep.mubr.msk.bf16.mxu1 %vm67_vm0, %v209_v3 }
   0x6   :  { %8 = vsyncpa [#allocation3], 0  ;;  %v170_v6 = vld [vmem:[%s302_s2] ss:$0 sm:$0xff]  ;;  %vm145_vm1 = vcmask 130048   ;;  %s236_s25 = smov [#allocation2]  }
   0x7   :  { %190 = vmatpush3.bf16.msra.mxu0 %v207_v1  ;;  %202 = vmatpush3.bf16.msra.mxu1 %v207_v1  ;;  %s159_s26 = sshll.u32 %s236_s25, 4  ;;  %s160_s26 = int_to_ptr.vmem [resolvable:$true] %s159_s26 }
   0x8   :  { %s212_s0 = scalar_lea.vmem %s160_s26, 1024  ;;  %p217_p1 = scmp.lt.s32.totalorder %s160_s26, %s160_s26 }
   0x9   :  { %p213_p0 = scmp.ne.s32.totalorder %s160_s26, %s212_s0  ;;  %p218_p2 = scmp.lt.s32.totalorder %s212_s0, %s212_s0 }
   0xa   :  { %192 = vmatmul.mubr.msk.bf16.vlgmr.msra.gmra.mrb[0].mxu0 %vm67_vm0, %v210_v4  ;;  %196 = vmatmul.mubr.msk.bf16.vlgmr.msra.gmra.mrb[0].mxu1 %vm67_vm0, %v211_v5 }
   0xb   :  { %p219_p3 = por %p218_p2, %p217_p1 }
   0xd   :  { %p220_p4 = pnand %p219_p3, %p213_p0 }
  0xdd   :  { %v193_v7 = vpop.f32.mrb[0].mxu0  ;;  %v197_v8 = vpop.f32.mrb[0].mxu1 }
  0xde   :  { %v123_v9 = vadd.f32 %v193_v7, %v170_v6  ;;  %v139_v10 = vadd.f32 %v197_v8, %v170_v6  ;;  %v114_v11 = vpop.f32.mrb[1].mxu0  ;;  %v130_v12 = vpop.f32.mrb[1].mxu1 }
  0xdf   :  { %v115_v13 = vadd.f32 %v170_v6, %v114_v11  ;;  %v131_v14 = vadd.f32 %v170_v6, %v130_v12  ;;  %v194_v15 = vpop.f32.mrb[2].mxu0  ;;  %v198_v16 = vpop.f32.mrb[2].mxu1 }
  0xe0   :  { %148 = vst.msk [vmem:[#allocation2 + $0x10] sm:$0xff] %vm145_vm1, %v123_v9  ;;  %152 = vst.msk [vmem:[#allocation2 + $0x30] sm:$0xff] %vm145_vm1, %v139_v10  ;;  %v126_v17 = vadd.f32 %v194_v15, %v170_v6  ;;  %v142_v18 = vadd.f32 %v198_v16, %v170_v6  ;;  %v117_v19 = vpop.f32.mrb[3].mxu0  ;;  %v133_v20 = vpop.f32.mrb[3].mxu1 }
  0xe1   :  { %146 = vst.msk [vmem:[#allocation2] sm:$0xff] %vm145_vm1, %v115_v13  ;;  %150 = vst.msk [vmem:[#allocation2 + $0x20] sm:$0xff] %vm145_vm1, %v131_v14  ;;  %v118_v21 = vadd.f32 %v170_v6, %v117_v19  ;;  %v134_v22 = vadd.f32 %v170_v6, %v133_v20 }
  0xe2   :  { %149 = vst.msk [vmem:[#allocation2 + $0x18] sm:$0xff] %vm145_vm1, %v126_v17  ;;  %153 = vst.msk [vmem:[#allocation2 + $0x38] sm:$0xff] %vm145_vm1, %v142_v18 }
  0xe3   :  { %147 = vst.msk [vmem:[#allocation2 + $0x8] sm:$0xff] %vm145_vm1, %v118_v21  ;;  %151 = vst.msk [vmem:[#allocation2 + $0x28] sm:$0xff] %vm145_vm1, %v134_v22 }
  0xe4   :  { %223 = shalt.err (!%p220_p4)
}
  0xe5   :  { %s224_s28 = scalar_lea.hbm %s303_s3, 1024 }
  0xe6   :  { %p225_p5 = scmp.ne.s32.totalorder %s303_s3, %s224_s28  ;;  %p228_p6 = scmp.lt.u32.totalorder %s224_s28, %s303_s3 }
  0xe8   :  { %p230_p7 = pnand %p228_p6, %p225_p5 }
  0xea   :  { %233 = shalt.err (!%p230_p7)
}
  0xeb   :  { %s237_s6 = smov 128   ;;  %s238_s7 = smov 8  }
  0xec   :  { %165 = dma.vmem_to_hbm [thread:$0]  %s160_s26, 1024, %s303_s3, [#allocation3], %s237_s6, %s237_s6, %s238_s7  }
  0xed   :  { %234 = dma.done.wait [#allocation3], 1024  }
  0xee   :  { %235 = vsyncadd [#allocation3], 4294966272 }
  0xef   :  { %169 = vsyncpa [#allocation3], 1 }

// kernel: rnn_many_to_many.3
= control target key start
LH: loop header
LB: loop body
LE: loop exit
PB: predicated region body
PF: predicated region fallthrough
CT: control target
= control target key end

     0   :  { %8 = vsyncpa [#allocation3], 0  ;;  %s199_s12 = smov [#allocation2]   ;;  %s276_s0 = inlined_call_operand.hbm [shape: f32[64,16], index: 0, kind: input, shape index: {}]   ;;  %s277_s1 = inlined_call_operand.vmem [shape: bf16[16,32], index: 1, kind: input, shape index: {}]   ;;  %s278_s2 = inlined_call_operand.vmem [shape: f32[1,32], index: 2, kind: input, shape index: {}]   ;;  %s279_s3 = inlined_call_operand.vmem [shape: f32[64,32], index: 3, kind: output, shape index: {}]  }
   0x1   :  { %s14_s13 = sshll.u32 %s199_s12, 4  ;;  %s175_s16 = scalar_lea.hbm %s276_s0, 1024  ;;  %s15_s13 = int_to_ptr.vmem [resolvable:$true] %s14_s13 }
   0x2   :  { %p176_p0 = scmp.ne.s32.totalorder %s276_s0, %s175_s16  ;;  %p179_p1 = scmp.lt.u32.totalorder %s175_s16, %s276_s0 }
   0x4   :  { %p181_p2 = pnand %p179_p1, %p176_p0 }
   0x6   :  { %184 = shalt.err (!%p181_p2)
}
   0x7   :  { %s185_s21 = scalar_lea.vmem %s15_s13, 1024  ;;  %p190_p4 = scmp.lt.s32.totalorder %s15_s13, %s15_s13 }
   0x8   :  { %p186_p3 = scmp.ne.s32.totalorder %s15_s13, %s185_s21  ;;  %p191_p5 = scmp.lt.s32.totalorder %s185_s21, %s185_s21 }
   0xa   :  { %p192_p6 = por %p191_p5, %p190_p4 }
   0xc   :  { %p193_p7 = pnand %p192_p6, %p186_p3 }
   0xe   :  { %196 = shalt.err (!%p193_p7)
}
   0xf   :  { %s200_s22 = smov 128   ;;  %s201_s23 = smov 8  }
  0x10   :  { %20 = dma.hbm_to_vmem [thread:$0]  %s276_s0, 1024, %s15_s13, [#allocation3], %s200_s22, %s200_s22, %s201_s23  }
  0x11   :  { %197 = dma.done.wait [#allocation3], 1024  }
  0x12   :  { %198 = vsyncadd [#allocation3], 4294966272  ;;  %v174_v0 = vld [vmem:[%s277_s1] sm:$0xff]   ;;  %v30_v2 = vld [vmem:[#allocation2 + $0x8] sm:$0xff]  ;;  %vm56_vm0 = vcmask 130048   ;;  %vm134_vm1 = vcmask 261120  }
  0x13   :  { %v29_v1 = vld [vmem:[#allocation2] sm:$0xff]  ;;  %159 = vmatprep.subr.bf16.mxu0 %v174_v0  ;;  %169 = vmatprep.subr.bf16.mxu1 %v174_v0  ;;  %v34_v5 = vld [vmem:[#allocation2 + $0x28] sm:$0xff]  ;;  %v31_v6 = vld [vmem:[#allocation2 + $0x10] sm:$0xff] }
  0x14   :  { %v33_v3 = vld [vmem:[#allocation2 + $0x20] sm:$0xff]  ;;  %v37_v4 = vpack.c.bf16 %v30_v2, %v29_v1  ;;  %v32_v7 = vld [vmem:[#allocation2 + $0x18] sm:$0xff]  ;;  %160 = vmatpush3.bf16.msra.mxu0 %v174_v0  ;;  %170 = vmatpush3.bf16.msra.mxu1 %v174_v0  ;;  %v35_v10 = vld [vmem:[#allocation2 + $0x30] sm:$0xff] }
  0x15   :  { %v39_v8 = vpack.c.bf16 %v34_v5, %v33_v3  ;;  %v38_v9 = vpack.c.bf16 %v32_v7, %v31_v6  ;;  %v36_v11 = vld [vmem:[#allocation2 + $0x38] sm:$0xff]  ;;  %v148_v13 = vld [vmem:[%s278_s2] ss:$0 sm:$0xff] }
  0x16   :  { %161 = vmatprep.mubr.msk.bf16.mxu0 %vm56_vm0, %v37_v4  ;;  %v40_v12 = vpack.c.bf16 %v36_v11, %v35_v10 }
  0x17   :  { %165 = vmatprep.mubr.msk.bf16.mxu1 %vm56_vm0, %v39_v8  ;;  %162 = vmatmul.mubr.msk.bf16.vlgmr.msra.gmra.mrb[0].mxu0 %vm56_vm0, %v38_v9 }
  0x18   :  { %166 = vmatmul.mubr.msk.bf16.vlgmr.msra.gmra.mrb[0].mxu1 %vm56_vm0, %v40_v12 }
  0xea   :  { %v163_v14 = vpop.f32.mrb[0].mxu0 }
  0xeb   :  { %v167_v15 = vpop.f32.mrb[0].mxu1  ;;  %v112_v16 = vadd.f32 %v163_v14, %v148_v13  ;;  %v103_v18 = vpop.f32.mrb[1].mxu0 }
  0xec   :  { %v128_v17 = vadd.f32 %v167_v15, %v148_v13  ;;  %v119_v19 = vpop.f32.mrb[1].mxu1  ;;  %v104_v20 = vadd.f32 %v148_v13, %v103_v18  ;;  %v164_v22 = vpop.f32.mrb[2].mxu0 }
  0xed   :  { %v120_v21 = vadd.f32 %v148_v13, %v119_v19  ;;  %v168_v23 = vpop.f32.mrb[2].mxu1  ;;  %137 = vst.msk [vmem:[%s279_s3 + $0x10] sm:$0xff] %vm134_vm1, %v112_v16  ;;  %v115_v24 = vadd.f32 %v164_v22, %v148_v13  ;;  %v106_v26 = vpop.f32.mrb[3].mxu0 }
  0xee   :  { %141 = vst.msk [vmem:[%s279_s3 + $0x30] sm:$0xff] %vm134_vm1, %v128_v17  ;;  %v131_v25 = vadd.f32 %v168_v23, %v148_v13  ;;  %v122_v27 = vpop.f32.mrb[3].mxu1  ;;  %135 = vst.msk [vmem:[%s279_s3] sm:$0xff] %vm134_vm1, %v104_v20  ;;  %v107_v28 = vadd.f32 %v148_v13, %v106_v26 }
  0xef   :  { %139 = vst.msk [vmem:[%s279_s3 + $0x20] sm:$0xff] %vm134_vm1, %v120_v21  ;;  %v123_v29 = vadd.f32 %v148_v13, %v122_v27  ;;  %138 = vst.msk [vmem:[%s279_s3 + $0x18] sm:$0xff] %vm134_vm1, %v115_v24 }
  0xf0   :  { %142 = vst.msk [vmem:[%s279_s3 + $0x38] sm:$0xff] %vm134_vm1, %v131_v25  ;;  %136 = vst.msk [vmem:[%s279_s3 + $0x8] sm:$0xff] %vm134_vm1, %v107_v28 }
  0xf1   :  { %140 = vst.msk [vmem:[%s279_s3 + $0x28] sm:$0xff] %vm134_vm1, %v123_v29 }
  0xf2   :  { %147 = vsyncpa [#allocation3], 1 }

// kernel: rnn_many_to_many.4
= control target key start
LH: loop header
LB: loop body
LE: loop exit
PB: predicated region body
PF: predicated region fallthrough
CT: control target
= control target key end

     0   :  { %v747_v1 = vmov 0.0   ;;  %vm748_vm0 = vmmov 0   ;;  %v749_v3 = vmov 0   ;;  %s927_s0 = inlined_call_operand.vmem [shape: f32[64,32], index: 0, kind: input, shape index: {}]   ;;  %s928_s1 = inlined_call_operand.vmem [shape: bf16[32,32], index: 1, kind: input, shape index: {}]   ;;  %s929_s2 = inlined_call_operand.vmem [shape: bf16[64,32], index: 2, kind: output, shape index: {0}]   ;;  %s930_s3 = inlined_call_operand.hbm [shape: f32[8,32], index: 3, kind: output, shape index: {1}]  }
   0x1   :  { %v691_v0 = vld [vmem:[%s928_s1] sm:$0xff]   ;;  %623 = vmatprep.subr.bf16.mxu0 %v747_v1  ;;  %631 = vmatprep.subr.bf16.mxu1 %v747_v1  ;;  %v692_v2 = vld [vmem:[%s928_s1 + $0x8] sm:$0xff]  }
   0x2   :  { %624 = vmatpush3.bf16.msra.mxu0 %v691_v0  ;;  %627 = vmatprep.mubr.msk.bf16.mxu0 %vm748_vm0, %v747_v1 }
   0x3   :  { %625 = vmatprep.subr.bf16.mxu0 %v747_v1  ;;  %635 = vmatprep.mubr.msk.bf16.mxu1 %vm748_vm0, %v747_v1 }
   0x6   :  { %626 = vmatpush3.bf16.msra.mxu0 %v692_v2 }
   0x7   :  { %639 = vmatprep.subr.bf16.mxu0 %v747_v1 }
   0x9   :  { %628 = vmatmul.mubr.bf16.vlgmr.msra.gmra.mrb[0].mxu0 %v749_v3 }
   0xa   :  { %643 = vmatprep.mubr.msk.bf16.mxu0 %vm748_vm0, %v747_v1 }
   0xb   :  { %9 = vsyncpa [#allocation3], 0  ;;  %v693_v4 = vld [vmem:[%s928_s1] sm:$0xff]   ;;  %v694_v5 = vld [vmem:[%s928_s1 + $0x8] sm:$0xff]   ;;  %vm79_vm1 = vcmask 257024   ;;  %vm32_vm2 = vcmask 261120  }
   0xc   :  { %632 = vmatpush3.bf16.msra.mxu1 %v693_v4  ;;  %v15_v6 = vld [vmem:[%s927_s0] sm:$0xff]  ;;  %v696_v15 = vld [vmem:[%s928_s1 + $0x8] sm:$0xff]   ;;  %v569_v26 = vld [vmem:[%s927_s0 + $0x10] sm:$0xff]  ;;  %s750_s19 = smov [#allocation2]  }
   0xd   :  { %633 = vmatprep.subr.bf16.mxu1 %v747_v1  ;;  %v695_v14 = vld [vmem:[%s928_s1] sm:$0xff]   ;;  %v564_v16 = vld [vmem:[%s927_s0 + $0x8] sm:$0xff]  ;;  %v574_v36 = vld [vmem:[%s927_s0 + $0x18] sm:$0xff]  ;;  %s552_s20 = sshll.u32 %s750_s19, 4  ;;  %s553_s20 = int_to_ptr.vmem [resolvable:$true] %s552_s20 }
   0xe   :  { %640 = vmatpush3.bf16.msra.mxu0 %v695_v14  ;;  %v697_v24 = vld [vmem:[%s928_s1] sm:$0xff]   ;;  %v698_v25 = vld [vmem:[%s928_s1 + $0x8] sm:$0xff]   ;;  %v589_v3 = vld [vmem:[%s927_s0 + $0x30] sm:$0xff]  ;;  %s723_s21 = scalar_lea.vmem %s553_s20, 128  ;;  %p728_p1 = scmp.lt.s32.totalorder %s553_s20, %s553_s20 }
   0xf   :  { %641 = vmatprep.subr.bf16.mxu0 %v747_v1  ;;  %v699_v34 = vld [vmem:[%s928_s1] sm:$0xff]   ;;  %v700_v35 = vld [vmem:[%s928_s1 + $0x8] sm:$0xff]   ;;  %p724_p0 = scmp.ne.s32.totalorder %s553_s20, %s723_s21  ;;  %p729_p2 = scmp.lt.s32.totalorder %s723_s21, %s723_s21 }
  0x10   :  { %634 = vmatpush3.bf16.msra.mxu1 %v694_v5  ;;  %v701_v44 = vld [vmem:[%s928_s1] sm:$0xff]   ;;  %v702_v45 = vld [vmem:[%s928_s1 + $0x8] sm:$0xff]  }
  0x11   :  { %647 = vmatprep.subr.bf16.mxu1 %v747_v1  ;;  %v579_v46 = vld [vmem:[%s927_s0 + $0x20] sm:$0xff]  ;;  %v704_v55 = vld [vmem:[%s928_s1 + $0x8] sm:$0xff]   ;;  %p730_p3 = por %p729_p2, %p728_p1 }
  0x12   :  { %642 = vmatpush3.bf16.msra.mxu0 %v696_v15  ;;  %v703_v54 = vld [vmem:[%s928_s1] sm:$0xff]   ;;  %v584_v56 = vld [vmem:[%s927_s0 + $0x28] sm:$0xff] }
  0x13   :  { %655 = vmatprep.subr.bf16.mxu0 %v747_v1  ;;  %v705_v0 = vld [vmem:[%s928_s1] sm:$0xff]   ;;  %v706_v2 = vld [vmem:[%s928_s1 + $0x8] sm:$0xff]   ;;  %p731_p4 = pnand %p730_p3, %p724_p0 }
  0xdc   :  { %v70_v7 = vpop.f32.mrb[0].mxu0 }
  0xdd   :  { %v76_v8 = vadd.f32 %v70_v7, %v15_v6  ;;  %v629_v9 = vpop.f32.mrb[1].mxu0 }
  0xde   :  { %v73_v10 = vpop.f32.mrb[2].mxu0 }
  0xdf   :  { %707 = vtanh.f32 %v76_v8  ;;  %v630_v11 = vpop.f32.mrb[3].mxu0 }
  0xe9   :  { %v708_v12 = vpop.eup %707 }
  0xea   :  { %v78_v13 = vpack.c.bf16 %v708_v12, %v708_v12 }
  0xec   :  { %80 = vst.msk [vmem:[%s929_s2] sm:$0xf] %vm79_vm1, %v78_v13  ;;  %636 = vmatmul.mubr.msk.bf16.vlgmr.msra.gmra.mrb[0].mxu1 %vm32_vm2, %v78_v13 }
  0xed   :  { %651 = vmatprep.mubr.msk.bf16.mxu1 %vm748_vm0, %v747_v1  ;;  %648 = vmatpush3.bf16.msra.mxu1 %v697_v24 }
  0xee   :  { %649 = vmatprep.subr.bf16.mxu1 %v747_v1 }
  0xf1   :  { %650 = vmatpush3.bf16.msra.mxu1 %v698_v25 }
  0xf2   :  { %663 = vmatprep.subr.bf16.mxu1 %v747_v1 }
 0x1bf   :  { %v136_v17 = vpop.f32.mrb[0].mxu1 }
 0x1c0   :  { %v142_v18 = vadd.f32 %v564_v16, %v136_v17  ;;  %v637_v19 = vpop.f32.mrb[1].mxu1 }
 0x1c1   :  { %v139_v20 = vpop.f32.mrb[2].mxu1 }
 0x1c2   :  { %709 = vtanh.f32 %v142_v18  ;;  %v638_v21 = vpop.f32.mrb[3].mxu1 }
 0x1cc   :  { %v710_v22 = vpop.eup %709 }
 0x1cd   :  { %v144_v23 = vpack.c.bf16 %v710_v22, %v710_v22 }
 0x1cf   :  { %568 = vst.msk [vmem:[%s929_s2 + $0x4] sm:$0xf] %vm79_vm1, %v144_v23  ;;  %644 = vmatmul.mubr.msk.bf16.vlgmr.msra.gmra.mrb[4].mxu0 %vm32_vm2, %v144_v23 }
 0x1d0   :  { %659 = vmatprep.mubr.msk.bf16.mxu0 %vm748_vm0, %v747_v1  ;;  %656 = vmatpush3.bf16.msra.mxu0 %v699_v34 }
 0x1d1   :  { %657 = vmatprep.subr.bf16.mxu0 %v747_v1 }
 0x1d4   :  { %658 = vmatpush3.bf16.msra.mxu0 %v700_v35 }
 0x1d5   :  { %671 = vmatprep.subr.bf16.mxu0 %v747_v1 }
 0x2a2   :  { %v202_v27 = vpop.f32.mrb[4].mxu0 }
 0x2a3   :  { %v208_v28 = vadd.f32 %v569_v26, %v202_v27  ;;  %v645_v29 = vpop.f32.mrb[5].mxu0 }
 0x2a4   :  { %v205_v30 = vpop.f32.mrb[6].mxu0 }
 0x2a5   :  { %711 = vtanh.f32 %v208_v28  ;;  %v646_v31 = vpop.f32.mrb[7].mxu0 }
 0x2af   :  { %v712_v32 = vpop.eup %711 }
 0x2b0   :  { %v210_v33 = vpack.c.bf16 %v712_v32, %v712_v32 }
 0x2b2   :  { %573 = vst.msk [vmem:[%s929_s2 + $0x8] sm:$0xf] %vm79_vm1, %v210_v33  ;;  %652 = vmatmul.mubr.msk.bf16.vlgmr.msra.gmra.mrb[4].mxu1 %vm32_vm2, %v210_v33 }
 0x2b3   :  { %667 = vmatprep.mubr.msk.bf16.mxu1 %vm748_vm0, %v747_v1  ;;  %664 = vmatpush3.bf16.msra.mxu1 %v701_v44 }
 0x2b4   :  { %665 = vmatprep.subr.bf16.mxu1 %v747_v1 }
 0x2b7   :  { %666 = vmatpush3.bf16.msra.mxu1 %v702_v45 }
 0x2b8   :  { %679 = vmatprep.subr.bf16.mxu1 %v747_v1 }
 0x385   :  { %v268_v37 = vpop.f32.mrb[4].mxu1 }
 0x386   :  { %v274_v38 = vadd.f32 %v574_v36, %v268_v37  ;;  %v653_v39 = vpop.f32.mrb[5].mxu1 }
 0x387   :  { %v271_v40 = vpop.f32.mrb[6].mxu1 }
 0x388   :  { %713 = vtanh.f32 %v274_v38  ;;  %v654_v41 = vpop.f32.mrb[7].mxu1 }
 0x392   :  { %v714_v42 = vpop.eup %713 }
 0x393   :  { %v276_v43 = vpack.c.bf16 %v714_v42, %v714_v42 }
 0x395   :  { %578 = vst.msk [vmem:[%s929_s2 + $0xc] sm:$0xf] %vm79_vm1, %v276_v43  ;;  %660 = vmatmul.mubr.msk.bf16.vlgmr.msra.gmra.mrb[8].mxu0 %vm32_vm2, %v276_v43 }
 0x396   :  { %675 = vmatprep.mubr.msk.bf16.mxu0 %vm748_vm0, %v747_v1  ;;  %672 = vmatpush3.bf16.msra.mxu0 %v703_v54 }
 0x397   :  { %673 = vmatprep.subr.bf16.mxu0 %v747_v1 }
 0x39a   :  { %674 = vmatpush3.bf16.msra.mxu0 %v704_v55 }
 0x468   :  { %v334_v47 = vpop.f32.mrb[8].mxu0 }
 0x469   :  { %v340_v48 = vadd.f32 %v579_v46, %v334_v47  ;;  %v661_v49 = vpop.f32.mrb[9].mxu0 }
 0x46a   :  { %v337_v50 = vpop.f32.mrb[10].mxu0 }
 0x46b   :  { %715 = vtanh.f32 %v340_v48  ;;  %v662_v51 = vpop.f32.mrb[11].mxu0 }
 0x475   :  { %v716_v52 = vpop.eup %715 }
 0x476   :  { %v342_v53 = vpack.c.bf16 %v716_v52, %v716_v52 }
 0x478   :  { %583 = vst.msk [vmem:[%s929_s2 + $0x10] sm:$0xf] %vm79_vm1, %v342_v53  ;;  %668 = vmatmul.mubr.msk.bf16.vlgmr.msra.gmra.mrb[8].mxu1 %vm32_vm2, %v342_v53 }
 0x479   :  { %683 = vmatprep.mubr.msk.bf16.mxu1 %vm748_vm0, %v747_v1  ;;  %680 = vmatpush3.bf16.msra.mxu1 %v705_v0 }
 0x47a   :  { %681 = vmatprep.subr.bf16.mxu1 %v747_v1  ;;  %v594_v1 = vld [vmem:[%s927_s0 + $0x38] sm:$0xff] }
 0x47d   :  { %682 = vmatpush3.bf16.msra.mxu1 %v706_v2 }
 0x54b   :  { %v400_v57 = vpop.f32.mrb[8].mxu1 }
 0x54c   :  { %v406_v58 = vadd.f32 %v584_v56, %v400_v57  ;;  %v669_v59 = vpop.f32.mrb[9].mxu1 }
 0x54d   :  { %v403_v60 = vpop.f32.mrb[10].mxu1 }
 0x54e   :  { %717 = vtanh.f32 %v406_v58  ;;  %v670_v61 = vpop.f32.mrb[11].mxu1 }
 0x558   :  { %v718_v62 = vpop.eup %717 }
 0x559   :  { %v408_v63 = vpack.c.bf16 %v718_v62, %v718_v62 }
 0x55b   :  { %588 = vst.msk [vmem:[%s929_s2 + $0x14] sm:$0xf] %vm79_vm1, %v408_v63  ;;  %676 = vmatmul.mubr.msk.bf16.vlgmr.msra.gmra.mrb[12].mxu0 %vm32_vm2, %v408_v63 }
 0x62e   :  { %v466_v4 = vpop.f32.mrb[12].mxu0 }
 0x62f   :  { %v472_v5 = vadd.f32 %v589_v3, %v466_v4  ;;  %v677_v6 = vpop.f32.mrb[13].mxu0 }
 0x630   :  { %v469_v7 = vpop.f32.mrb[14].mxu0 }
 0x631   :  { %719 = vtanh.f32 %v472_v5  ;;  %v678_v8 = vpop.f32.mrb[15].mxu0 }
 0x63b   :  { %v720_v9 = vpop.eup %719 }
 0x63c   :  { %v474_v10 = vpack.c.bf16 %v720_v9, %v720_v9 }
 0x63e   :  { %593 = vst.msk [vmem:[%s929_s2 + $0x18] sm:$0xf] %vm79_vm1, %v474_v10  ;;  %684 = vmatmul.mubr.msk.bf16.vlgmr.msra.gmra.mrb[12].mxu1 %vm32_vm2, %v474_v10 }
 0x711   :  { %v532_v11 = vpop.f32.mrb[12].mxu1 }
 0x712   :  { %v538_v12 = vadd.f32 %v594_v1, %v532_v11  ;;  %v685_v13 = vpop.f32.mrb[13].mxu1 }
 0x713   :  { %v535_v14 = vpop.f32.mrb[14].mxu1 }
 0x714   :  { %721 = vtanh.f32 %v538_v12  ;;  %v686_v15 = vpop.f32.mrb[15].mxu1 }
 0x71e   :  { %v722_v16 = vpop.eup %721 }
 0x71f   :  { %v540_v17 = vpack.c.bf16 %v722_v16, %v722_v16  ;;  %543 = vst.msk [vmem:[#allocation2] sm:$0xff] %vm32_vm2, %v722_v16 }
 0x720   :  { %734 = shalt.err (!%p731_p4)
}
 0x721   :  { %s735_s23 = scalar_lea.hbm %s930_s3, 128 }
 0x722   :  { %p736_p5 = scmp.ne.s32.totalorder %s930_s3, %s735_s23  ;;  %p739_p6 = scmp.lt.u32.totalorder %s735_s23, %s930_s3 }
 0x724   :  { %p741_p7 = pnand %p739_p6, %p736_p5 }
 0x726   :  { %744 = shalt.err (!%p741_p7)
}
 0x727   :  { %555 = dma.vmem_to_hbm [thread:$0]  %s553_s20, 128, %s930_s3, [#allocation3]   ;;  %598 = vst.msk [vmem:[%s929_s2 + $0x1c] sm:$0xf] %vm79_vm1, %v540_v17 }
 0x728   :  { %745 = dma.done.wait [#allocation3], 128  }
 0x729   :  { %746 = vsyncadd [#allocation3], 4294967168 }
 0x72a   :  { %561 = vsyncpa [#allocation3], 1 }

</bundles_post_ra>
